<compile_context>
chip_gen: v7x
topology: tpu7x:2x2x1
jax: 0.10.0
libtpu: 0.0.40
codegen_flags: <defaults>
</compile_context>

<pallas_src>
import functools

import jax
import jax.numpy as jnp
from jax.experimental import pallas as pl
from jax.experimental.pallas import tpu as pltpu

LANE = 128


def _diou3d_kernel(boxes_ref, out_ref, *, eps, tm, n_valid, reduce_partial):
    # boxes_ref: (12, tm, LANE) feature-major block.
    #   rows 0..5  = pred  (x, y, z, dx, dy, dz)
    #   rows 6..11 = gt    (x, y, z, dx, dy, dz)
    # box global index = (program_id * tm + sublane) * LANE + lane
    px, py, pz = boxes_ref[0], boxes_ref[1], boxes_ref[2]
    pdx, pdy, pdz = boxes_ref[3], boxes_ref[4], boxes_ref[5]
    gx, gy, gz = boxes_ref[6], boxes_ref[7], boxes_ref[8]
    gdx, gdy, gdz = boxes_ref[9], boxes_ref[10], boxes_ref[11]

    # 2D corners: corner[0] = center - 0.5*dim, corner[2] = center + 0.5*dim
    q_min_x, q_max_x = px - 0.5 * pdx, px + 0.5 * pdx
    q_min_y, q_max_y = py - 0.5 * pdy, py + 0.5 * pdy
    g_min_x, g_max_x = gx - 0.5 * gdx, gx + 0.5 * gdx
    g_min_y, g_max_y = gy - 0.5 * gdy, gy + 0.5 * gdy

    # intersection (xy)
    inter_x = jnp.maximum(jnp.minimum(q_max_x, g_max_x) -
                          jnp.maximum(q_min_x, g_min_x), 0.0)
    inter_y = jnp.maximum(jnp.minimum(q_max_y, g_max_y) -
                          jnp.maximum(q_min_y, g_min_y), 0.0)
    # intersection (z)
    inter_h = jnp.maximum(
        jnp.minimum(pz + 0.5 * pdz, gz + 0.5 * gdz) -
        jnp.maximum(pz - 0.5 * pdz, gz - 0.5 * gdz), 0.0)

    volume_pred = pdx * pdy * pdz
    volume_gt = gdx * gdy * gdz
    volume_inter = inter_x * inter_y * inter_h
    volume_union = volume_gt + volume_pred - volume_inter + eps

    # squared center distance
    inter_diag = (gx - px) ** 2 + (gy - py) ** 2 + (gz - pz) ** 2

    # enclosing box diagonal
    outer_x = jnp.maximum(jnp.maximum(q_max_x, g_max_x) -
                          jnp.minimum(q_min_x, g_min_x), 0.0)
    outer_y = jnp.maximum(jnp.maximum(q_max_y, g_max_y) -
                          jnp.minimum(q_min_y, g_min_y), 0.0)
    outer_h = jnp.maximum(
        jnp.maximum(gz + 0.5 * gdz, pz + 0.5 * pdz) -
        jnp.minimum(gz - 0.5 * gdz, pz - 0.5 * pdz), 0.0)
    outer_diag = outer_x ** 2 + outer_y ** 2 + outer_h ** 2 + eps

    # divides -> reciprocal (EUP) * multiply (VPU)
    dious = (volume_inter * pl.reciprocal(volume_union) -
             inter_diag * pl.reciprocal(outer_diag))
    dious = jnp.clip(dious, -1.0, 1.0)

    # in-kernel validity mask (padded lanes must not contribute to the sum)
    row = jax.lax.broadcasted_iota(jnp.int32, (tm, LANE), 0)
    col = jax.lax.broadcasted_iota(jnp.int32, (tm, LANE), 1)
    gidx = pl.program_id(0) * (tm * LANE) + row * LANE + col
    loss = jnp.where(gidx < n_valid, 1.0 - dious, 0.0)

    if reduce_partial:
        # fused reduction: sublane-reduce to a (1, LANE) partial per grid step
        out_ref[...] = jnp.sum(loss, axis=0, keepdims=True)
    else:
        out_ref[...] = loss


def _round_up(x, m):
    return (x + m - 1) // m * m


def _pack_feature_major(pred, target, n_pad):
    """Concatenate pred/gt (heading dropped), zero-pad, and lay out as
    (12, n_pad // 128, 128): feature x sublane-tile x lane; box b lives at
    (tile=b // 128, lane=b % 128).  One fused XLA transpose/pad over one slab.
    """
    n = pred.shape[0]
    boxes = jnp.concatenate([pred[:, :6].astype(jnp.float32),
                             target[:, :6].astype(jnp.float32)], axis=1)
    slab = jnp.zeros((n_pad, 12), jnp.float32).at[:n].set(boxes)
    return slab.T.reshape(12, n_pad // LANE, LANE)


def diou3d_loss_pallas(pred, target, *, eps=1e-6, reduction="mean",
                       loss_weight=1.0):
    """Pallas implementation of DIoU3DLoss.forward (weight=None path)."""
    assert pred.shape == target.shape and pred.shape[1] == 7
    assert reduction in ("none", "mean", "sum")
    n = pred.shape[0]

    n_tiles = max(1, _round_up(n, LANE) // LANE)     # 128-box tiles needed
    tm = min(64, _round_up(n_tiles, 8))              # sublane rows per step (sweepable 8..128)
    n_tiles_pad = _round_up(n_tiles, tm)
    grid = n_tiles_pad // tm
    n_pad = n_tiles_pad * LANE

    slab = _pack_feature_major(pred, target, n_pad)

    reduce_partial = reduction != "none"
    kernel = functools.partial(_diou3d_kernel, eps=float(eps), tm=tm,
                               n_valid=n, reduce_partial=reduce_partial)

    if reduce_partial:
        out_shape = jax.ShapeDtypeStruct((1, grid * LANE), jnp.float32)
        out_spec = pl.BlockSpec((1, LANE), lambda i: (0, i))
    else:
        out_shape = jax.ShapeDtypeStruct((n_tiles_pad, LANE), jnp.float32)
        out_spec = pl.BlockSpec((tm, LANE), lambda i: (i, 0))

    out = pl.pallas_call(
        kernel,
        out_shape=out_shape,
        grid=(grid,),
        in_specs=[pl.BlockSpec((12, tm, LANE), lambda i: (0, i, 0))],
        out_specs=out_spec,
        compiler_params=pltpu.CompilerParams(
            dimension_semantics=("parallel",)),   # keeps v7x 2-TC sharding
    )(slab)

    if reduction == "none":
        result = out.reshape(-1)[:n]
    elif reduction == "sum":
        result = jnp.sum(out)
    else:  # mean
        result = jnp.sum(out) / n
    return loss_weight * result


def _diou3d_loss_ref(pred, gt, eps=1e-6, reduction="mean"):
    """Pure-JAX reference mirroring the PyTorch code."""
    q_min = pred[:, :2] - 0.5 * pred[:, 3:5]
    q_max = pred[:, :2] + 0.5 * pred[:, 3:5]
    g_min = gt[:, :2] - 0.5 * gt[:, 3:5]
    g_max = gt[:, :2] + 0.5 * gt[:, 3:5]
    inter = jnp.maximum(jnp.minimum(q_max, g_max) - jnp.maximum(q_min, g_min), 0.0)
    inter_h = jnp.maximum(
        jnp.minimum(pred[:, 2] + 0.5 * pred[:, 5], gt[:, 2] + 0.5 * gt[:, 5]) -
        jnp.maximum(pred[:, 2] - 0.5 * pred[:, 5], gt[:, 2] - 0.5 * gt[:, 5]), 0.0)
    vol_p = pred[:, 3] * pred[:, 4] * pred[:, 5]
    vol_g = gt[:, 3] * gt[:, 4] * gt[:, 5]
    vol_i = inter[:, 0] * inter[:, 1] * inter_h
    vol_u = vol_g + vol_p - vol_i + eps
    inter_diag = jnp.sum((gt[:, :3] - pred[:, :3]) ** 2, -1)
    outer = jnp.maximum(jnp.maximum(q_max, g_max) - jnp.minimum(q_min, g_min), 0.0)
    outer_h = jnp.maximum(
        jnp.maximum(gt[:, 2] + 0.5 * gt[:, 5], pred[:, 2] + 0.5 * pred[:, 5]) -
        jnp.minimum(gt[:, 2] - 0.5 * gt[:, 5], pred[:, 2] - 0.5 * pred[:, 5]), 0.0)
    outer_diag = outer[:, 0] ** 2 + outer[:, 1] ** 2 + outer_h ** 2 + eps
    dious = jnp.clip(vol_i / vol_u - inter_diag / outer_diag, -1.0, 1.0)
    loss = 1.0 - dious
    if reduction == "none":
        return loss
    if reduction == "sum":
        return jnp.sum(loss)
    return jnp.mean(loss)


def _make_boxes(key, n):
    k1, k2, k3, k4, k5, k6 = jax.random.split(key, 6)
    pred_center = jax.random.normal(k1, (n, 3), jnp.float32) * 2.0
    pred_dims = jax.random.uniform(k2, (n, 3), jnp.float32, 0.5, 3.0)
    pred_yaw = jax.random.uniform(k3, (n, 1), jnp.float32, -3.14, 3.14)
    pred = jnp.concatenate([pred_center, pred_dims, pred_yaw], axis=1)

    gt_center = pred_center + jax.random.normal(k4, (n, 3), jnp.float32) * 0.5
    gt_dims = jax.random.uniform(k5, (n, 3), jnp.float32, 0.5, 3.0)
    gt_yaw = jax.random.uniform(k6, (n, 1), jnp.float32, -3.14, 3.14)
    target = jnp.concatenate([gt_center, gt_dims, gt_yaw], axis=1)
    return pred, target


if __name__ == "__main__":
    key = jax.random.PRNGKey(0)
    k_a, k_b = jax.random.split(key, 2)

    # small case (N=8 boxes of 7 params), reduction='mean'
    pred, target = _make_boxes(k_a, 8)
    loss = jax.block_until_ready(
        diou3d_loss_pallas(pred, target, eps=1e-6, reduction="mean",
                           loss_weight=1.0))
    ref = jax.block_until_ready(_diou3d_loss_ref(pred, target, eps=1e-6))
    assert jnp.allclose(loss, ref, atol=1e-5, rtol=1e-5), (loss, ref)

    # slightly larger case exercising the in-kernel padding mask + fused sum
    pred2, target2 = _make_boxes(k_b, 300)
    loss2 = jax.block_until_ready(
        diou3d_loss_pallas(pred2, target2, eps=1e-6, reduction="mean"))
    ref2 = jax.block_until_ready(_diou3d_loss_ref(pred2, target2, eps=1e-6))
    assert jnp.allclose(loss2, ref2, atol=1e-5, rtol=1e-5), (loss2, ref2)

    # reduction='none' path (per-box vector output)
    loss_vec = jax.block_until_ready(
        diou3d_loss_pallas(pred2, target2, eps=1e-6, reduction="none"))
    ref_vec = jax.block_until_ready(
        _diou3d_loss_ref(pred2, target2, eps=1e-6, reduction="none"))
    assert loss_vec.shape == (300,)
    assert jnp.allclose(loss_vec, ref_vec, atol=1e-5, rtol=1e-5)

    print("KERNEL_OK")
</pallas_src>

<mosaic_0001>
module attributes {stable_mosaic.version = 11 : i64} {
  func.func @_diou3d_kernel(%arg0: i32, %arg1: memref<12x8x128xf32, #tpu.memory_space<vmem>>, %arg2: memref<1x128xf32, #tpu.memory_space<vmem>>) attributes {dimension_semantics = [#tpu.dimension_semantics<parallel>], iteration_bounds = array<i64: 1>, scalar_prefetch = 0 : i64, scratch_operands = 0 : i64, tpu.core_type = #tpu.core_type<tc>, window_params = [{transform_indices = @transform_0, window_bounds = array<i64: 12, 8, 128>}, {transform_indices = @transform_1, window_bounds = array<i64: 1, 128>}]} {
    %c0 = arith.constant 0 : index
    %c0_0 = arith.constant 0 : index
    %c0_1 = arith.constant 0 : index
    %0 = vector.load %arg1[%c0, %c0_0, %c0_1] : memref<12x8x128xf32, #tpu.memory_space<vmem>>, vector<1x8x128xf32>
    %1 = vector.shape_cast %0 : vector<1x8x128xf32> to vector<8x128xf32>
    %c1 = arith.constant 1 : index
    %c0_2 = arith.constant 0 : index
    %c0_3 = arith.constant 0 : index
    %2 = vector.load %arg1[%c1, %c0_2, %c0_3] : memref<12x8x128xf32, #tpu.memory_space<vmem>>, vector<1x8x128xf32>
    %3 = vector.shape_cast %2 : vector<1x8x128xf32> to vector<8x128xf32>
    %c2 = arith.constant 2 : index
    %c0_4 = arith.constant 0 : index
    %c0_5 = arith.constant 0 : index
    %4 = vector.load %arg1[%c2, %c0_4, %c0_5] : memref<12x8x128xf32, #tpu.memory_space<vmem>>, vector<1x8x128xf32>
    %5 = vector.shape_cast %4 : vector<1x8x128xf32> to vector<8x128xf32>
    %c3 = arith.constant 3 : index
    %c0_6 = arith.constant 0 : index
    %c0_7 = arith.constant 0 : index
    %6 = vector.load %arg1[%c3, %c0_6, %c0_7] : memref<12x8x128xf32, #tpu.memory_space<vmem>>, vector<1x8x128xf32>
    %7 = vector.shape_cast %6 : vector<1x8x128xf32> to vector<8x128xf32>
    %c4 = arith.constant 4 : index
    %c0_8 = arith.constant 0 : index
    %c0_9 = arith.constant 0 : index
    %8 = vector.load %arg1[%c4, %c0_8, %c0_9] : memref<12x8x128xf32, #tpu.memory_space<vmem>>, vector<1x8x128xf32>
    %9 = vector.shape_cast %8 : vector<1x8x128xf32> to vector<8x128xf32>
    %c5 = arith.constant 5 : index
    %c0_10 = arith.constant 0 : index
    %c0_11 = arith.constant 0 : index
    %10 = vector.load %arg1[%c5, %c0_10, %c0_11] : memref<12x8x128xf32, #tpu.memory_space<vmem>>, vector<1x8x128xf32>
    %11 = vector.shape_cast %10 : vector<1x8x128xf32> to vector<8x128xf32>
    %c6 = arith.constant 6 : index
    %c0_12 = arith.constant 0 : index
    %c0_13 = arith.constant 0 : index
    %12 = vector.load %arg1[%c6, %c0_12, %c0_13] : memref<12x8x128xf32, #tpu.memory_space<vmem>>, vector<1x8x128xf32>
    %13 = vector.shape_cast %12 : vector<1x8x128xf32> to vector<8x128xf32>
    %c7 = arith.constant 7 : index
    %c0_14 = arith.constant 0 : index
    %c0_15 = arith.constant 0 : index
    %14 = vector.load %arg1[%c7, %c0_14, %c0_15] : memref<12x8x128xf32, #tpu.memory_space<vmem>>, vector<1x8x128xf32>
    %15 = vector.shape_cast %14 : vector<1x8x128xf32> to vector<8x128xf32>
    %c8 = arith.constant 8 : index
    %c0_16 = arith.constant 0 : index
    %c0_17 = arith.constant 0 : index
    %16 = vector.load %arg1[%c8, %c0_16, %c0_17] : memref<12x8x128xf32, #tpu.memory_space<vmem>>, vector<1x8x128xf32>
    %17 = vector.shape_cast %16 : vector<1x8x128xf32> to vector<8x128xf32>
    %c9 = arith.constant 9 : index
    %c0_18 = arith.constant 0 : index
    %c0_19 = arith.constant 0 : index
    %18 = vector.load %arg1[%c9, %c0_18, %c0_19] : memref<12x8x128xf32, #tpu.memory_space<vmem>>, vector<1x8x128xf32>
    %19 = vector.shape_cast %18 : vector<1x8x128xf32> to vector<8x128xf32>
    %c10 = arith.constant 10 : index
    %c0_20 = arith.constant 0 : index
    %c0_21 = arith.constant 0 : index
    %20 = vector.load %arg1[%c10, %c0_20, %c0_21] : memref<12x8x128xf32, #tpu.memory_space<vmem>>, vector<1x8x128xf32>
    %21 = vector.shape_cast %20 : vector<1x8x128xf32> to vector<8x128xf32>
    %c11 = arith.constant 11 : index
    %c0_22 = arith.constant 0 : index
    %c0_23 = arith.constant 0 : index
    %22 = vector.load %arg1[%c11, %c0_22, %c0_23] : memref<12x8x128xf32, #tpu.memory_space<vmem>>, vector<1x8x128xf32>
    %23 = vector.shape_cast %22 : vector<1x8x128xf32> to vector<8x128xf32>
    %cst = arith.constant 5.000000e-01 : f32
    %24 = vector.broadcast %cst : f32 to vector<8x128xf32>
    %25 = arith.mulf %24, %7 : vector<8x128xf32>
    %26 = arith.subf %1, %25 : vector<8x128xf32>
    %cst_24 = arith.constant 5.000000e-01 : f32
    %27 = vector.broadcast %cst_24 : f32 to vector<8x128xf32>
    %28 = arith.mulf %27, %7 : vector<8x128xf32>
    %29 = arith.addf %1, %28 : vector<8x128xf32>
    %cst_25 = arith.constant 5.000000e-01 : f32
    %30 = vector.broadcast %cst_25 : f32 to vector<8x128xf32>
    %31 = arith.mulf %30, %9 : vector<8x128xf32>
    %32 = arith.subf %3, %31 : vector<8x128xf32>
    %cst_26 = arith.constant 5.000000e-01 : f32
    %33 = vector.broadcast %cst_26 : f32 to vector<8x128xf32>
    %34 = arith.mulf %33, %9 : vector<8x128xf32>
    %35 = arith.addf %3, %34 : vector<8x128xf32>
    %cst_27 = arith.constant 5.000000e-01 : f32
    %36 = vector.broadcast %cst_27 : f32 to vector<8x128xf32>
    %37 = arith.mulf %36, %19 : vector<8x128xf32>
    %38 = arith.subf %13, %37 : vector<8x128xf32>
    %cst_28 = arith.constant 5.000000e-01 : f32
    %39 = vector.broadcast %cst_28 : f32 to vector<8x128xf32>
    %40 = arith.mulf %39, %19 : vector<8x128xf32>
    %41 = arith.addf %13, %40 : vector<8x128xf32>
    %cst_29 = arith.constant 5.000000e-01 : f32
    %42 = vector.broadcast %cst_29 : f32 to vector<8x128xf32>
    %43 = arith.mulf %42, %21 : vector<8x128xf32>
    %44 = arith.subf %15, %43 : vector<8x128xf32>
    %cst_30 = arith.constant 5.000000e-01 : f32
    %45 = vector.broadcast %cst_30 : f32 to vector<8x128xf32>
    %46 = arith.mulf %45, %21 : vector<8x128xf32>
    %47 = arith.addf %15, %46 : vector<8x128xf32>
    %48 = arith.minimumf %29, %41 : vector<8x128xf32>
    %49 = arith.maximumf %26, %38 : vector<8x128xf32>
    %50 = arith.subf %48, %49 : vector<8x128xf32>
    %cst_31 = arith.constant 0.000000e+00 : f32
    %51 = vector.broadcast %cst_31 : f32 to vector<8x128xf32>
    %52 = arith.maximumf %50, %51 : vector<8x128xf32>
    %53 = arith.minimumf %35, %47 : vector<8x128xf32>
    %54 = arith.maximumf %32, %44 : vector<8x128xf32>
    %55 = arith.subf %53, %54 : vector<8x128xf32>
    %cst_32 = arith.constant 0.000000e+00 : f32
    %56 = vector.broadcast %cst_32 : f32 to vector<8x128xf32>
    %57 = arith.maximumf %55, %56 : vector<8x128xf32>
    %cst_33 = arith.constant 5.000000e-01 : f32
    %58 = vector.broadcast %cst_33 : f32 to vector<8x128xf32>
    %59 = arith.mulf %58, %11 : vector<8x128xf32>
    %60 = arith.addf %5, %59 : vector<8x128xf32>
    %cst_34 = arith.constant 5.000000e-01 : f32
    %61 = vector.broadcast %cst_34 : f32 to vector<8x128xf32>
    %62 = arith.mulf %61, %23 : vector<8x128xf32>
    %63 = arith.addf %17, %62 : vector<8x128xf32>
    %64 = arith.minimumf %60, %63 : vector<8x128xf32>
    %cst_35 = arith.constant 5.000000e-01 : f32
    %65 = vector.broadcast %cst_35 : f32 to vector<8x128xf32>
    %66 = arith.mulf %65, %11 : vector<8x128xf32>
    %67 = arith.subf %5, %66 : vector<8x128xf32>
    %cst_36 = arith.constant 5.000000e-01 : f32
    %68 = vector.broadcast %cst_36 : f32 to vector<8x128xf32>
    %69 = arith.mulf %68, %23 : vector<8x128xf32>
    %70 = arith.subf %17, %69 : vector<8x128xf32>
    %71 = arith.maximumf %67, %70 : vector<8x128xf32>
    %72 = arith.subf %64, %71 : vector<8x128xf32>
    %cst_37 = arith.constant 0.000000e+00 : f32
    %73 = vector.broadcast %cst_37 : f32 to vector<8x128xf32>
    %74 = arith.maximumf %72, %73 : vector<8x128xf32>
    %75 = arith.mulf %7, %9 : vector<8x128xf32>
    %76 = arith.mulf %75, %11 : vector<8x128xf32>
    %77 = arith.mulf %19, %21 : vector<8x128xf32>
    %78 = arith.mulf %77, %23 : vector<8x128xf32>
    %79 = arith.mulf %52, %57 : vector<8x128xf32>
    %80 = arith.mulf %79, %74 : vector<8x128xf32>
    %81 = arith.addf %78, %76 : vector<8x128xf32>
    %82 = arith.subf %81, %80 : vector<8x128xf32>
    %cst_38 = arith.constant 9.99999997E-7 : f32
    %83 = vector.broadcast %cst_38 : f32 to vector<8x128xf32>
    %84 = arith.addf %82, %83 : vector<8x128xf32>
    %85 = arith.subf %13, %1 : vector<8x128xf32>
    %86 = arith.mulf %85, %85 : vector<8x128xf32>
    %87 = arith.subf %15, %3 : vector<8x128xf32>
    %88 = arith.mulf %87, %87 : vector<8x128xf32>
    %89 = arith.addf %86, %88 : vector<8x128xf32>
    %90 = arith.subf %17, %5 : vector<8x128xf32>
    %91 = arith.mulf %90, %90 : vector<8x128xf32>
    %92 = arith.addf %89, %91 : vector<8x128xf32>
    %93 = arith.maximumf %29, %41 : vector<8x128xf32>
    %94 = arith.minimumf %26, %38 : vector<8x128xf32>
    %95 = arith.subf %93, %94 : vector<8x128xf32>
    %cst_39 = arith.constant 0.000000e+00 : f32
    %96 = vector.broadcast %cst_39 : f32 to vector<8x128xf32>
    %97 = arith.maximumf %95, %96 : vector<8x128xf32>
    %98 = arith.maximumf %35, %47 : vector<8x128xf32>
    %99 = arith.minimumf %32, %44 : vector<8x128xf32>
    %100 = arith.subf %98, %99 : vector<8x128xf32>
    %cst_40 = arith.constant 0.000000e+00 : f32
    %101 = vector.broadcast %cst_40 : f32 to vector<8x128xf32>
    %102 = arith.maximumf %100, %101 : vector<8x128xf32>
    %cst_41 = arith.constant 5.000000e-01 : f32
    %103 = vector.broadcast %cst_41 : f32 to vector<8x128xf32>
    %104 = arith.mulf %103, %23 : vector<8x128xf32>
    %105 = arith.addf %17, %104 : vector<8x128xf32>
    %cst_42 = arith.constant 5.000000e-01 : f32
    %106 = vector.broadcast %cst_42 : f32 to vector<8x128xf32>
    %107 = arith.mulf %106, %11 : vector<8x128xf32>
    %108 = arith.addf %5, %107 : vector<8x128xf32>
    %109 = arith.maximumf %105, %108 : vector<8x128xf32>
    %cst_43 = arith.constant 5.000000e-01 : f32
    %110 = vector.broadcast %cst_43 : f32 to vector<8x128xf32>
    %111 = arith.mulf %110, %23 : vector<8x128xf32>
    %112 = arith.subf %17, %111 : vector<8x128xf32>
    %cst_44 = arith.constant 5.000000e-01 : f32
    %113 = vector.broadcast %cst_44 : f32 to vector<8x128xf32>
    %114 = arith.mulf %113, %11 : vector<8x128xf32>
    %115 = arith.subf %5, %114 : vector<8x128xf32>
    %116 = arith.minimumf %112, %115 : vector<8x128xf32>
    %117 = arith.subf %109, %116 : vector<8x128xf32>
    %cst_45 = arith.constant 0.000000e+00 : f32
    %118 = vector.broadcast %cst_45 : f32 to vector<8x128xf32>
    %119 = arith.maximumf %117, %118 : vector<8x128xf32>
    %120 = arith.mulf %97, %97 : vector<8x128xf32>
    %121 = arith.mulf %102, %102 : vector<8x128xf32>
    %122 = arith.addf %120, %121 : vector<8x128xf32>
    %123 = arith.mulf %119, %119 : vector<8x128xf32>
    %124 = arith.addf %122, %123 : vector<8x128xf32>
    %cst_46 = arith.constant 9.99999997E-7 : f32
    %125 = vector.broadcast %cst_46 : f32 to vector<8x128xf32>
    %126 = arith.addf %124, %125 : vector<8x128xf32>
    %127 = tpu.reciprocal %84 : vector<8x128xf32> -> vector<8x128xf32>
    %128 = arith.mulf %80, %127 : vector<8x128xf32>
    %129 = tpu.reciprocal %126 : vector<8x128xf32> -> vector<8x128xf32>
    %130 = arith.mulf %92, %129 : vector<8x128xf32>
    %131 = arith.subf %128, %130 : vector<8x128xf32>
    %cst_47 = arith.constant -1.000000e+00 : f32
    %cst_48 = arith.constant 1.000000e+00 : f32
    %132 = vector.broadcast %cst_47 : f32 to vector<8x128xf32>
    %133 = arith.maximumf %132, %131 : vector<8x128xf32>
    %134 = vector.broadcast %cst_48 : f32 to vector<8x128xf32>
    %135 = arith.minimumf %134, %133 : vector<8x128xf32>
    %136 = tpu.iota {dimensions = array<i32: 0>} : vector<8x128xi32>
    %137 = tpu.iota {dimensions = array<i32: 1>} : vector<8x128xi32>
    %c1024_i32 = arith.constant 1024 : i32
    %138 = arith.muli %arg0, %c1024_i32 : i32
    %c128_i32 = arith.constant 128 : i32
    %139 = vector.broadcast %c128_i32 : i32 to vector<8x128xi32>
    %140 = arith.muli %136, %139 : vector<8x128xi32>
    %141 = vector.broadcast %138 : i32 to vector<8x128xi32>
    %142 = arith.addi %141, %140 : vector<8x128xi32>
    %143 = arith.addi %142, %137 : vector<8x128xi32>
    %c8_i32 = arith.constant 8 : i32
    %144 = vector.broadcast %c8_i32 : i32 to vector<8x128xi32>
    %145 = arith.cmpi slt, %143, %144 : vector<8x128xi32>
    %cst_49 = arith.constant 1.000000e+00 : f32
    %146 = vector.broadcast %cst_49 : f32 to vector<8x128xf32>
    %147 = arith.subf %146, %135 : vector<8x128xf32>
    %cst_50 = arith.constant 0.000000e+00 : f32
    %148 = vector.broadcast %cst_50 : f32 to vector<8x128xf32>
    %149 = arith.select %145, %147, %148 : vector<8x128xi1>, vector<8x128xf32>
    %cst_51 = arith.constant dense<0.000000e+00> : vector<128xf32>
    %150 = vector.multi_reduction <add>, %149, %cst_51 [0] : vector<8x128xf32> to vector<128xf32>
    %151 = vector.shape_cast %150 : vector<128xf32> to vector<1x128xf32>
    %c0_52 = arith.constant 0 : index
    %c0_53 = arith.constant 0 : index
    %152 = vector.load %arg2[%c0_52, %c0_53] : memref<1x128xf32, #tpu.memory_space<vmem>>, vector<1x128xf32>
    tpu.vector_store %arg2[%c0_52, %c0_53], %151 {strides = array<i32>} : memref<1x128xf32, #tpu.memory_space<vmem>>, vector<1x128xf32>,
    return
  }
  func.func @transform_0(%arg0: i32) -> (i32, i32, i32) {
    %c0_i32 = arith.constant 0 : i32
    %c0_i32_0 = arith.constant 0 : i32
    %c0_i32_1 = arith.constant 0 : i32
    return %c0_i32, %arg0, %c0_i32_0 : i32, i32, i32
  }
  func.func @transform_1(%arg0: i32) -> (i32, i32) {
    %c0_i32 = arith.constant 0 : i32
    %c0_i32_0 = arith.constant 0 : i32
    return %c0_i32, %arg0 : i32, i32
  }
}

</mosaic_0001>

<bundles_post_ra>
// kernel: tpu_custom_call.1
= control target key start
LH: loop header
LB: loop body
LE: loop exit
PB: predicated region body
PF: predicated region fallthrough
CT: control target
= control target key end

     0   :  { %6 = vsyncpa [#allocation3], 0  ;;  %s262_s0 = inlined_call_operand.hbm [shape: f32[12,8,128], index: 0, kind: input, shape index: {}]   ;;  %s263_s1 = inlined_call_operand.hbm [shape: f32[1,128], index: 1, kind: output, shape index: {}]  }
   0x1   :  { %7 = vsyncpa [#allocation4], 0  ;;  %s209_s6 = smov [#allocation2]   ;;  %s161_s10 = scalar_lea.hbm %s262_s0, 1536 }
   0x2   :  { %s13_s7 = sshll.u32 %s209_s6, 4  ;;  %p162_p0 = scmp.ne.s32.totalorder %s262_s0, %s161_s10  ;;  %s14_s7 = int_to_ptr.vmem [resolvable:$true] %s13_s7 }
   0x3   :  { %p165_p1 = scmp.lt.u32.totalorder %s161_s10, %s262_s0 }
   0x5   :  { %p167_p2 = pnand %p165_p1, %p162_p0 }
   0x7   :  { %170 = shalt.err (!%p167_p2)
}
   0x8   :  { %s171_s15 = scalar_lea.vmem %s14_s7, 1536  ;;  %p176_p4 = scmp.lt.s32.totalorder %s14_s7, %s14_s7 }
   0x9   :  { %p172_p3 = scmp.ne.s32.totalorder %s14_s7, %s171_s15  ;;  %p177_p5 = scmp.lt.s32.totalorder %s171_s15, %s171_s15 }
   0xb   :  { %p178_p6 = por %p177_p5, %p176_p4 }
   0xd   :  { %p179_p7 = pnand %p178_p6, %p172_p3 }
   0xf   :  { %182 = shalt.err (!%p179_p7)
}
  0x10   :  { %s210_s16 = smov 128   ;;  %s211_s17 = smov 8  }
  0x11   :  { %19 = dma.hbm_to_vmem [thread:$0]  %s262_s0, 1536, %s14_s7, [#allocation3], %s210_s16, %s210_s16, %s211_s17  }
  0x12   :  { %205 = dma.done.wait [#allocation3], 1536  }
  0x13   :  { %206 = vsyncadd [#allocation3], 4294965760  ;;  %v235_v0 = vld [vmem:[#allocation2] sm:$0xff]  ;;  %v237_v1 = vld [vmem:[#allocation2 + $0x8] sm:$0xff]  ;;  %s212_s0 = smov [#allocation5]  }
  0x14   :  { %v29_v2 = vld [vmem:[#allocation2 + $0x18] sm:$0xff]  ;;  %v31_v3 = vld [vmem:[#allocation2 + $0x20] sm:$0xff]  ;;  %v33_v4 = vld [vmem:[#allocation2 + $0x28] sm:$0xff]  ;;  %s143_s20 = sshll.u32 %s212_s0, 4  ;;  %s144_s20 = int_to_ptr.vmem [resolvable:$true] %s143_s20 }
  0x15   :  { %v239_v5 = vld [vmem:[#allocation2 + $0x10] sm:$0xff]  ;;  %v46_v6 = vmul.f32 0.5, %v29_v2  ;;  %v49_v7 = vmul.f32 0.5, %v31_v3  ;;  %v66_v8 = vmul.f32 0.5, %v33_v4  ;;  %v41_v9 = vld [vmem:[#allocation2 + $0x48] sm:$0xff]  ;;  %v45_v11 = vld [vmem:[#allocation2 + $0x58] sm:$0xff]  ;;  %v76_v24 = vmul.f32 %v31_v3, %v29_v2  ;;  %p188_p9 = scmp.lt.s32.totalorder %s144_s20, %s144_s20 }
  0x16   :  { %v43_v10 = vld [vmem:[#allocation2 + $0x50] sm:$0xff]  ;;  %v37_v13 = vld [vmem:[#allocation2 + $0x38] sm:$0xff]  ;;  %v39_v17 = vld [vmem:[#allocation2 + $0x40] sm:$0xff]  ;;  %v52_v19 = vmul.f32 0.5, %v41_v9  ;;  %v68_v21 = vmul.f32 0.5, %v45_v11  ;;  %s183_s21 = scalar_lea.vmem %s144_s20, 16 }
  0x17   :  { %v35_v12 = vld [vmem:[#allocation2 + $0x30] sm:$0xff]  ;;  %v47_v14 = vsub.f32 %v235_v0, %v46_v6  ;;  %v48_v15 = vadd.f32 %v46_v6, %v235_v0  ;;  %v50_v16 = vsub.f32 %v237_v1, %v49_v7  ;;  %v51_v18 = vadd.f32 %v49_v7, %v237_v1  ;;  %p184_p8 = scmp.ne.s32.totalorder %s144_s20, %s183_s21  ;;  %s187_s22 = scalar_lea.vmem %s144_s20, 32 }
  0x18   :  { %v55_v20 = vmul.f32 0.5, %v43_v10  ;;  %v67_v22 = vadd.f32 %v66_v8, %v239_v5  ;;  %v71_v23 = vsub.f32 %v239_v5, %v66_v8  ;;  %v78_v25 = vmul.f32 %v43_v10, %v41_v9  ;;  %p189_p10 = scmp.lt.s32.totalorder %s187_s22, %s183_s21 }
  0x19   :  { %v53_v26 = vsub.f32 %v35_v12, %v52_v19  ;;  %v54_v27 = vadd.f32 %v52_v19, %v35_v12  ;;  %v69_v30 = vadd.f32 %v68_v21, %v39_v17  ;;  %v72_v31 = vsub.f32 %v39_v17, %v68_v21 }
  0x1a   :  { %v56_v28 = vsub.f32 %v37_v13, %v55_v20  ;;  %v57_v29 = vadd.f32 %v55_v20, %v37_v13  ;;  %v77_v38 = vmul.f32 %v76_v24, %v33_v4  ;;  %v79_v41 = vmul.f32 %v78_v25, %v45_v11  ;;  %p190_p11 = por %p189_p10, %p188_p9 }
  0x1b   :  { %v58_v32 = vmin.f32 %v48_v15, %v54_v27  ;;  %v59_v33 = vmax.f32 %v47_v14, %v53_v26  ;;  %v70_v36 = vmin.f32 %v67_v22, %v69_v30  ;;  %v73_v37 = vmax.f32 %v71_v23, %v72_v31 }
  0x1c   :  { %v62_v34 = vmin.f32 %v51_v18, %v57_v29  ;;  %v63_v35 = vmax.f32 %v50_v16, %v56_v28  ;;  %v93_v42 = vmax.f32 %v48_v15, %v54_v27  ;;  %v94_v44 = vmin.f32 %v47_v14, %v53_v26  ;;  %p191_p12 = pnand %p190_p11, %p184_p8 }
  0x1d   :  { %v60_v39 = vsub.f32 %v58_v32, %v59_v33  ;;  %v74_v43 = vsub.f32 %v70_v36, %v73_v37  ;;  %v97_v45 = vmax.f32 %v51_v18, %v57_v29  ;;  %v98_v46 = vmin.f32 %v50_v16, %v56_v28 }
  0x1e   :  { %v64_v40 = vsub.f32 %v62_v34, %v63_v35  ;;  %v101_v49 = vmax.f32 %v69_v30, %v67_v22  ;;  %v95_v51 = vsub.f32 %v93_v42, %v94_v44  ;;  %v102_v53 = vmin.f32 %v72_v31, %v71_v23 }
  0x1f   :  { %v61_v47 = vmax.f32 %v60_v39, 0.0  ;;  %v75_v50 = vmax.f32 %v74_v43, 0.0  ;;  %v99_v52 = vsub.f32 %v97_v45, %v98_v46  ;;  %v82_v55 = vadd.f32 %v79_v41, %v77_v38 }
  0x20   :  { %v65_v48 = vmax.f32 %v64_v40, 0.0  ;;  %v96_v56 = vmax.f32 %v95_v51, 0.0  ;;  %v103_v58 = vsub.f32 %v101_v49, %v102_v53  ;;  %v85_v6 = vsub.f32 %v35_v12, %v235_v0 }
  0x21   :  { %v100_v57 = vmax.f32 %v99_v52, 0.0  ;;  %v87_v7 = vsub.f32 %v37_v13, %v237_v1  ;;  %v90_v14 = vsub.f32 %v39_v17, %v239_v5  ;;  %v118_v15 = vlaneseq }
  0x22   :  { %v80_v54 = vmul.f32 %v65_v48, %v61_v47  ;;  %v104_v60 = vmax.f32 %v103_v58, 0.0  ;;  %v105_v61 = vmul.f32 %v96_v56, %v96_v56  ;;  %v86_v10 = vmul.f32 %v85_v6, %v85_v6 }
  0x23   :  { %v106_v62 = vmul.f32 %v100_v57, %v100_v57  ;;  %v88_v11 = vmul.f32 %v87_v7, %v87_v7  ;;  %v91_v18 = vmul.f32 %v90_v14, %v90_v14  ;;  %v119_v19 = vshrl.u32 %v118_v15, 7 }
  0x24   :  { %v81_v59 = vmul.f32 %v80_v54, %v75_v50  ;;  %v108_v3 = vmul.f32 %v104_v60, %v104_v60  ;;  %v121_v22 = vand.u32 127, %v118_v15 }
  0x25   :  { %v107_v2 = vadd.f32 %v106_v62, %v105_v61  ;;  %v89_v16 = vadd.f32 %v88_v11, %v86_v10  ;;  %v123_v23 = vmul.u32 128, %v119_v19 }
  0x26   :  { %v83_v63 = vsub.f32 %v82_v55, %v81_v59 }
  0x27   :  { %v109_v8 = vadd.f32 %v108_v3, %v107_v2  ;;  %v92_v21 = vadd.f32 %v91_v18, %v89_v16  ;;  %v126_v1 = vadd.s32 %v123_v23, %v121_v22 }
  0x28   :  { %v84_v4 = vadd.f32 1e-06, %v83_v63 }
  0x29   :  { %v110_v9 = vadd.f32 1e-06, %v109_v8  ;;  %vm127_vm0 = vcmp.lt.s32.totalorder %v126_v1, 8 }
  0x2a   :  { %157 = vrcp.f32 %v84_v4 }
  0x2b   :  { %159 = vrcp.f32 %v110_v9 }
  0x34   :  { %v158_v20 = vpop.eup %157 }
  0x35   :  { %v112_v24 = vmul.f32 %v158_v20, %v81_v59  ;;  %v160_v0 = vpop.eup %159 }
  0x36   :  { %v114_v12 = vmul.f32 %v160_v0, %v92_v21 }
  0x38   :  { %v115_v13 = vsub.f32 %v112_v24, %v114_v12 }
  0x3a   :  { %v152_v25 = vclamps-f32 %v115_v13, 1.0 }
  0x3c   :  { %v128_v26 = vsub.f32 1.0, %v152_v25 }
  0x3e   :  { %v129_v27 = vsel %vm127_vm0, %v128_v26, 0.0 }
  0x3f   :  { %v130_v28 = vrot.slane %v129_v27, 4 }
  0x41   :  { %v131_v5 = vadd.f32 %v130_v28, %v129_v27 }
  0x43   :  { %v132_v17 = vrot.slane %v131_v5, 2 }
  0x45   :  { %v133_v29 = vadd.f32 %v132_v17, %v131_v5 }
  0x47   :  { %v134_v30 = vrot.slane %v133_v29, 1 }
  0x49   :  { %v135_v31 = vadd.f32 %v134_v30, %v133_v29 }
  0x4b   :  { %136 = vst [vmem:[#allocation5] sm:$0x1] %v135_v31 }
  0x4c   :  { %194 = shalt.err (!%p191_p12)
}
  0x4d   :  { %s195_s25 = scalar_lea.hbm %s263_s1, 16 }
  0x4e   :  { %p196_p13 = scmp.ne.s32.totalorder %s263_s1, %s195_s25  ;;  %p199_p0 = scmp.lt.u32.totalorder %s195_s25, %s263_s1 }
  0x50   :  { %p201_p1 = pnand %p199_p0, %p196_p13 }
  0x52   :  { %204 = shalt.err (!%p201_p1)
}
  0x53   :  { %146 = dma.vmem_to_hbm [thread:$0]  %s144_s20, 16, %s263_s1, [#allocation4]  }
  0x54   :  { %207 = dma.done.wait [#allocation4], 16  }
  0x55   :  { %208 = vsyncadd [#allocation4], 4294967280 }
  0x56   :  { %150 = vsyncpa [#allocation3], 1 }
  0x57   :  { %151 = vsyncpa [#allocation4], 1 }

</bundles_post_ra>
